<compile_context>
chip_gen: v5e
topology: v5e:2x2
jax: 0.10.0
libtpu: 0.0.40
codegen_flags: <defaults>
</compile_context>

<pallas_src>
import math
import functools

import jax
import jax.numpy as jnp
from jax.experimental import pallas as pl
from jax.experimental.pallas import tpu as pltpu


def _round_up(x, m):
    return ((x + m - 1) // m) * m


def _tpu_compiler_params(dimension_semantics):
    cp_cls = getattr(pltpu, "CompilerParams", None)
    if cp_cls is None:  # fallback for older jax releases
        cp_cls = getattr(pltpu, "TPUCompilerParams")
    return cp_cls(dimension_semantics=dimension_semantics)


def res_attention_kernel(emb_u_ref, emb_h_ref, w1_ref, b1_ref, w2_ref, b2_ref,
                         out_ref, *, emb_dim):
    emb_u = emb_u_ref[...]                                   # (Bt, L, D) f32
    emb_h = emb_h_ref[...]                                   # (Bt, L, D) f32

    # a = (emb_u * emb_h).sum(-1) / sqrt(D)                  -> (Bt, L, 1)
    inv_sqrt_d = 1.0 / math.sqrt(emb_dim)
    scores = jnp.sum(emb_u * emb_h, axis=-1, keepdims=True) * inv_sqrt_d

    # softmax over the sequence axis (matches F.softmax on the 1-D per-example scores)
    m = jnp.max(scores, axis=1, keepdims=True)               # (Bt, 1, 1)
    e = jnp.exp(scores - m)                                  # (Bt, L, 1)
    denom = jnp.sum(e, axis=1, keepdims=True)                # (Bt, 1, 1)
    attn = e * pl.reciprocal(denom, approx=True)             # (Bt, L, 1)

    # Fused residual: attn @ emb_h + emb_h.sum(0) == sum((attn + 1) * emb_h, axis=seq)
    ctx = jnp.sum((attn + 1.0) * emb_h, axis=1)              # (Bt, D) f32

    # 2-layer MLP head on the MXU (bf16 inputs, f32 accumulation). No activation
    # between L1 and L2 in the original module — only the final sigmoid.
    cdt = w1_ref.dtype
    h = jnp.dot(ctx.astype(cdt), w1_ref[...],
                preferred_element_type=jnp.float32) + b1_ref[...]      # (Bt, HIDp)
    o = jnp.dot(h.astype(cdt), w2_ref[...],
                preferred_element_type=jnp.float32) + b2_ref[...]      # (Bt, Pp)

    out_ref[...] = jax.nn.sigmoid(o)


def res_attention_forward(emb_u, emb_h, w1, b1, w2, b2, *,
                          use_bf16=True, batch_tile=128):
    """Batched ResAttention forward.

    emb_u/emb_h: (B, L, D) or a single example (L, D).
    w1: (D, HID), b1: (HID,), w2: (HID, P), b2: (P,).
    Returns (B, P) for batched input, (P,) for a single example.
    """
    single = emb_u.ndim == 2
    if single:
        emb_u = emb_u[None]
        emb_h = emb_h[None]

    B, L, D = emb_u.shape
    HID = w1.shape[1]
    P = w2.shape[1]

    HIDp = _round_up(HID, 128)
    Pp = _round_up(P, 128)
    Bt = min(_round_up(batch_tile, 8), _round_up(B, 8))
    Bp = _round_up(B, Bt)

    # Zero-pad weights/biases to lane-dense shapes (padding contributes exact zeros).
    w1p = jnp.pad(w1.astype(jnp.float32), ((0, 0), (0, HIDp - HID)))
    b1p = jnp.pad(b1.reshape(1, -1).astype(jnp.float32), ((0, 0), (0, HIDp - HID)))
    w2p = jnp.pad(w2.astype(jnp.float32), ((0, HIDp - HID), (0, Pp - P)))
    b2p = jnp.pad(b2.reshape(1, -1).astype(jnp.float32), ((0, 0), (0, Pp - P)))

    if use_bf16:
        w1p = w1p.astype(jnp.bfloat16)
        w2p = w2p.astype(jnp.bfloat16)

    # Pad the batch to a multiple of the batch tile (padded rows are sliced off).
    if Bp != B:
        emb_u = jnp.pad(emb_u, ((0, Bp - B), (0, 0), (0, 0)))
        emb_h = jnp.pad(emb_h, ((0, Bp - B), (0, 0), (0, 0)))

    kernel = functools.partial(res_attention_kernel, emb_dim=D)

    out = pl.pallas_call(
        kernel,
        out_shape=jax.ShapeDtypeStruct((Bp, Pp), jnp.float32),
        grid=(Bp // Bt,),
        in_specs=[
            pl.BlockSpec((Bt, L, D), lambda i: (i, 0, 0)),   # emb_u batch tile
            pl.BlockSpec((Bt, L, D), lambda i: (i, 0, 0)),   # emb_h batch tile
            pl.BlockSpec((D, HIDp), lambda i: (0, 0)),       # W1  (resident)
            pl.BlockSpec((1, HIDp), lambda i: (0, 0)),       # b1
            pl.BlockSpec((HIDp, Pp), lambda i: (0, 0)),      # W2  (resident)
            pl.BlockSpec((1, Pp), lambda i: (0, 0)),         # b2
        ],
        out_specs=pl.BlockSpec((Bt, Pp), lambda i: (i, 0)),
        compiler_params=_tpu_compiler_params(("parallel",)),
    )(emb_u, emb_h, w1p, b1p, w2p, b2p)

    out = out[:B, :P]
    return out[0] if single else out


def res_attention_reference(emb_u, emb_h, w1, b1, w2, b2, emb_dim):
    """Pure-JAX reference matching the PyTorch module, vmapped over batch."""
    scores = jnp.sum(emb_u * emb_h, axis=-1) / math.sqrt(emb_dim)     # (B, L)
    attn = jax.nn.softmax(scores, axis=-1)                            # (B, L)
    ctx = jnp.einsum("bl,bld->bd", attn, emb_h) + jnp.sum(emb_h, axis=1)
    h = ctx @ w1 + b1.reshape(1, -1)
    o = h @ w2 + b2.reshape(1, -1)
    return jax.nn.sigmoid(o)


if __name__ == "__main__":
    USER_COUNT = 10
    POI_COUNT = 64
    EMB_DIM = 32
    HIDDEN = 1000          # hard-coded in the PyTorch module (L1 -> 1000)
    SEQ = 8                # length of `userid` / `H`
    BATCH = 16             # small batch to exercise the batched grid (2 tiles of 8)

    key = jax.random.PRNGKey(0)
    k_user, k_poi, k_w1, k_b1, k_w2, k_b2, k_uid, k_h = jax.random.split(key, 8)

    # xavier_normal init for the embedding tables
    std_u = math.sqrt(2.0 / (USER_COUNT + EMB_DIM))
    std_p = math.sqrt(2.0 / (POI_COUNT + EMB_DIM))
    user_pref = jax.random.normal(k_user, (USER_COUNT, EMB_DIM), jnp.float32) * std_u
    poi_pref = jax.random.normal(k_poi, (POI_COUNT, EMB_DIM), jnp.float32) * std_p

    # Linear layer params (stored transposed vs. nn.Linear: W1 (D,1000), W2 (1000,P))
    w1 = jax.random.normal(k_w1, (EMB_DIM, HIDDEN), jnp.float32) * (1.0 / math.sqrt(EMB_DIM))
    b1 = jax.random.normal(k_b1, (HIDDEN,), jnp.float32) * 0.01
    w2 = jax.random.normal(k_w2, (HIDDEN, POI_COUNT), jnp.float32) * (1.0 / math.sqrt(HIDDEN))
    b2 = jax.random.normal(k_b2, (POI_COUNT,), jnp.float32) * 0.01

    # forward inputs: a small batch of (userid, H) index sequences
    userid = jax.random.randint(k_uid, (BATCH, SEQ), 0, USER_COUNT, jnp.int32)
    H = jax.random.randint(k_h, (BATCH, SEQ), 0, POI_COUNT, jnp.int32)

    # embedding lookups (XLA glue)
    emb_u = jnp.take(user_pref, userid, axis=0)   # (BATCH, SEQ, EMB_DIM)
    emb_h = jnp.take(poi_pref, H, axis=0)         # (BATCH, SEQ, EMB_DIM)

    # batched kernel call (grid of 2 batch tiles of 8)
    out = res_attention_forward(emb_u, emb_h, w1, b1, w2, b2, batch_tile=8)
    out = jax.block_until_ready(out)

    ref = res_attention_reference(emb_u, emb_h, w1, b1, w2, b2, EMB_DIM)

    assert out.shape == (BATCH, POI_COUNT)
    assert bool(jnp.all(jnp.isfinite(out)))
    max_err = float(jnp.max(jnp.abs(out - ref)))
    assert max_err < 3e-2, f"kernel vs reference max abs err too large: {max_err}"

    # single-example path, matching the original module's forward(userid, H) exactly
    out_single = res_attention_forward(emb_u[0], emb_h[0], w1, b1, w2, b2)
    out_single = jax.block_until_ready(out_single)
    assert out_single.shape == (POI_COUNT,)
    assert float(jnp.max(jnp.abs(out_single - ref[0]))) < 3e-2

    print("KERNEL_OK")
</pallas_src>

<mosaic_0001>
module attributes {stable_mosaic.version = 11 : i64} {
  func.func @res_attention_kernel(%arg0: i32, %arg1: memref<8x8x32xf32, #tpu.memory_space<vmem>>, %arg2: memref<8x8x32xf32, #tpu.memory_space<vmem>>, %arg3: memref<32x1024xbf16, #tpu.memory_space<vmem>>, %arg4: memref<1x1024xf32, #tpu.memory_space<vmem>>, %arg5: memref<1024x128xbf16, #tpu.memory_space<vmem>>, %arg6: memref<1x128xf32, #tpu.memory_space<vmem>>, %arg7: memref<8x128xf32, #tpu.memory_space<vmem>>) attributes {dimension_semantics = [#tpu.dimension_semantics<parallel>], iteration_bounds = array<i64: 2>, scalar_prefetch = 0 : i64, scratch_operands = 0 : i64, tpu.core_type = #tpu.core_type<tc>, window_params = [{transform_indices = @transform_0, window_bounds = array<i64: 8, 8, 32>}, {transform_indices = @transform_1, window_bounds = array<i64: 8, 8, 32>}, {pipeline_mode = #tpu.pipeline_mode<synchronous>, transform_indices = @transform_2, window_bounds = array<i64: 32, 1024>}, {pipeline_mode = #tpu.pipeline_mode<synchronous>, transform_indices = @transform_3, window_bounds = array<i64: 1, 1024>}, {pipeline_mode = #tpu.pipeline_mode<synchronous>, transform_indices = @transform_4, window_bounds = array<i64: 1024, 128>}, {pipeline_mode = #tpu.pipeline_mode<synchronous>, transform_indices = @transform_5, window_bounds = array<i64: 1, 128>}, {transform_indices = @transform_6, window_bounds = array<i64: 8, 128>}]} {
    %c0 = arith.constant 0 : index
    %c0_0 = arith.constant 0 : index
    %c0_1 = arith.constant 0 : index
    %0 = vector.load %arg1[%c0, %c0_0, %c0_1] : memref<8x8x32xf32, #tpu.memory_space<vmem>>, vector<8x8x32xf32>
    %c0_2 = arith.constant 0 : index
    %c0_3 = arith.constant 0 : index
    %c0_4 = arith.constant 0 : index
    %1 = vector.load %arg2[%c0_2, %c0_3, %c0_4] : memref<8x8x32xf32, #tpu.memory_space<vmem>>, vector<8x8x32xf32>
    %2 = arith.mulf %0, %1 : vector<8x8x32xf32>
    %cst = arith.constant dense<0.000000e+00> : vector<8x8xf32>
    %3 = vector.multi_reduction <add>, %2, %cst [2] : vector<8x8x32xf32> to vector<8x8xf32>
    %4 = vector.shape_cast %3 : vector<8x8xf32> to vector<8x8x1xf32>
    %cst_5 = arith.constant 0.176776692 : f32
    %5 = vector.broadcast %cst_5 : f32 to vector<8x8x1xf32>
    %6 = arith.mulf %4, %5 : vector<8x8x1xf32>
    %cst_6 = arith.constant dense<0xFF800000> : vector<8x1xf32>
    %7 = vector.multi_reduction <maximumf>, %6, %cst_6 [1] : vector<8x8x1xf32> to vector<8x1xf32>
    %8 = vector.shape_cast %7 : vector<8x1xf32> to vector<8x1x1xf32>
    %9 = vector.broadcast %8 : vector<8x1x1xf32> to vector<8x8x1xf32>
    %10 = arith.subf %6, %9 : vector<8x8x1xf32>
    %11 = math.exp %10 : vector<8x8x1xf32>
    %cst_7 = arith.constant dense<0.000000e+00> : vector<8x1xf32>
    %12 = vector.multi_reduction <add>, %11, %cst_7 [1] : vector<8x8x1xf32> to vector<8x1xf32>
    %13 = vector.shape_cast %12 : vector<8x1xf32> to vector<8x1x1xf32>
    %14 = tpu.reciprocal %13 {approx = true} : vector<8x1x1xf32> -> vector<8x1x1xf32>
    %15 = vector.broadcast %14 : vector<8x1x1xf32> to vector<8x8x1xf32>
    %16 = arith.mulf %11, %15 : vector<8x8x1xf32>
    %cst_8 = arith.constant 1.000000e+00 : f32
    %17 = vector.broadcast %cst_8 : f32 to vector<8x8x1xf32>
    %18 = arith.addf %16, %17 : vector<8x8x1xf32>
    %19 = vector.broadcast %18 : vector<8x8x1xf32> to vector<8x8x32xf32>
    %20 = arith.mulf %19, %1 : vector<8x8x32xf32>
    %cst_9 = arith.constant dense<0.000000e+00> : vector<8x32xf32>
    %21 = vector.multi_reduction <add>, %20, %cst_9 [1] : vector<8x8x32xf32> to vector<8x32xf32>
    %22 = arith.truncf %21 : vector<8x32xf32> to vector<8x32xbf16>
    %c0_10 = arith.constant 0 : index
    %c0_11 = arith.constant 0 : index
    %23 = vector.load %arg3[%c0_10, %c0_11] : memref<32x1024xbf16, #tpu.memory_space<vmem>>, vector<32x1024xbf16>
    %cst_12 = arith.constant dense<0.000000e+00> : vector<8x1024xf32>
    %24 = tpu.matmul %22, %23, %cst_12 {dimension_numbers = #tpu.dot_dimension_numbers<[1], [0], [0], [1], [0, 0, 1, 1], [], []>} : vector<8x32xbf16>, vector<32x1024xbf16>, vector<8x1024xf32> -> vector<8x1024xf32>
    %c0_13 = arith.constant 0 : index
    %c0_14 = arith.constant 0 : index
    %25 = vector.load %arg4[%c0_13, %c0_14] : memref<1x1024xf32, #tpu.memory_space<vmem>>, vector<1x1024xf32>
    %26 = vector.broadcast %25 : vector<1x1024xf32> to vector<8x1024xf32>
    %27 = arith.addf %24, %26 : vector<8x1024xf32>
    %28 = arith.truncf %27 : vector<8x1024xf32> to vector<8x1024xbf16>
    %c0_15 = arith.constant 0 : index
    %c0_16 = arith.constant 0 : index
    %29 = vector.load %arg5[%c0_15, %c0_16] : memref<1024x128xbf16, #tpu.memory_space<vmem>>, vector<1024x128xbf16>
    %cst_17 = arith.constant dense<0.000000e+00> : vector<8x128xf32>
    %30 = tpu.matmul %28, %29, %cst_17 {dimension_numbers = #tpu.dot_dimension_numbers<[1], [0], [0], [1], [0, 0, 1, 1], [], []>} : vector<8x1024xbf16>, vector<1024x128xbf16>, vector<8x128xf32> -> vector<8x128xf32>
    %c0_18 = arith.constant 0 : index
    %c0_19 = arith.constant 0 : index
    %31 = vector.load %arg6[%c0_18, %c0_19] : memref<1x128xf32, #tpu.memory_space<vmem>>, vector<1x128xf32>
    %32 = vector.broadcast %31 : vector<1x128xf32> to vector<8x128xf32>
    %33 = arith.addf %30, %32 : vector<8x128xf32>
    %34 = arith.negf %33 : vector<8x128xf32>
    %35 = math.exp %34 : vector<8x128xf32>
    %cst_20 = arith.constant 1.000000e+00 : f32
    %36 = vector.broadcast %cst_20 : f32 to vector<8x128xf32>
    %37 = arith.addf %36, %35 : vector<8x128xf32>
    %38 = arith.divf %36, %37 : vector<8x128xf32>
    %c0_21 = arith.constant 0 : index
    %c0_22 = arith.constant 0 : index
    %39 = vector.load %arg7[%c0_21, %c0_22] : memref<8x128xf32, #tpu.memory_space<vmem>>, vector<8x128xf32>
    tpu.vector_store %arg7[%c0_21, %c0_22], %38 {strides = array<i32>} : memref<8x128xf32, #tpu.memory_space<vmem>>, vector<8x128xf32>,
    return
  }
  func.func @transform_0(%arg0: i32) -> (i32, i32, i32) {
    %c0_i32 = arith.constant 0 : i32
    %c0_i32_0 = arith.constant 0 : i32
    %c0_i32_1 = arith.constant 0 : i32
    return %arg0, %c0_i32, %c0_i32_0 : i32, i32, i32
  }
  func.func @transform_1(%arg0: i32) -> (i32, i32, i32) {
    %c0_i32 = arith.constant 0 : i32
    %c0_i32_0 = arith.constant 0 : i32
    %c0_i32_1 = arith.constant 0 : i32
    return %arg0, %c0_i32, %c0_i32_0 : i32, i32, i32
  }
  func.func @transform_2(%arg0: i32) -> (i32, i32) {
    %c0_i32 = arith.constant 0 : i32
    %c0_i32_0 = arith.constant 0 : i32
    %c0_i32_1 = arith.constant 0 : i32
    return %c0_i32, %c0_i32_0 : i32, i32
  }
  func.func @transform_3(%arg0: i32) -> (i32, i32) {
    %c0_i32 = arith.constant 0 : i32
    %c0_i32_0 = arith.constant 0 : i32
    %c0_i32_1 = arith.constant 0 : i32
    return %c0_i32, %c0_i32_0 : i32, i32
  }
  func.func @transform_4(%arg0: i32) -> (i32, i32) {
    %c0_i32 = arith.constant 0 : i32
    %c0_i32_0 = arith.constant 0 : i32
    %c0_i32_1 = arith.constant 0 : i32
    return %c0_i32, %c0_i32_0 : i32, i32
  }
  func.func @transform_5(%arg0: i32) -> (i32, i32) {
    %c0_i32 = arith.constant 0 : i32
    %c0_i32_0 = arith.constant 0 : i32
    %c0_i32_1 = arith.constant 0 : i32
    return %c0_i32, %c0_i32_0 : i32, i32
  }
  func.func @transform_6(%arg0: i32) -> (i32, i32) {
    %c0_i32 = arith.constant 0 : i32
    %c0_i32_0 = arith.constant 0 : i32
    return %arg0, %c0_i32 : i32, i32
  }
}

</mosaic_0001>

<bundles_post_ra>
// kernel: tpu_custom_call.1
= control target key start
LH: loop header
LB: loop body
LE: loop exit
PB: predicated region body
PF: predicated region fallthrough
CT: control target
= control target key end

     0   :  { %s2824_s0 = inlined_call_operand.hbm [shape: f32[16,8,32], index: 0, kind: input, shape index: {}]   ;;  %s2825_s1 = inlined_call_operand.hbm [shape: f32[16,8,32], index: 1, kind: input, shape index: {}]   ;;  %s2826_s2 = inlined_call_operand.hbm [shape: bf16[32,1024], index: 2, kind: input, shape index: {}]   ;;  %s2827_s3 = inlined_call_operand.hbm [shape: f32[1,1024], index: 3, kind: input, shape index: {}]   ;;  %s2828_s4 = inlined_call_operand.hbm [shape: bf16[1024,128], index: 4, kind: input, shape index: {}]   ;;  %s2829_s5 = inlined_call_operand.vmem [shape: f32[1,128], index: 5, kind: input, shape index: {}]   ;;  %s2830_s6 = inlined_call_operand.hbm [shape: f32[16,128], index: 6, kind: output, shape index: {}]  }
   0x1   :  { %2831 = sst [smem:[#allocation18_spill]] %s2824_s0 }
   0x2   :  { %2832 = sst [smem:[#allocation19_spill]] %s2826_s2 }
   0x3   :  { %2833 = sst [smem:[#allocation20_spill]] %s2827_s3 }
   0x4   :  { %2834 = sst [smem:[#allocation21_spill]] %s2828_s4 }
   0x5   :  { %11 = vsyncpa [#allocation3], 0 }
   0x6   :  { %13 = vsyncpa [#allocation3 + $0x1], 0 }
   0x7   :  { %14 = vsyncpa [#allocation6], 0 }
   0x8   :  { %16 = vsyncpa [#allocation6 + $0x1], 0 }
   0x9   :  { %17 = vsyncpa [#allocation9], 0 }
   0xa   :  { %18 = vsyncpa [#allocation4], 0 }
   0xb   :  { %20 = vsyncpa [#allocation4 + $0x1], 0  ;;  %s2507_s21 = smov 0   ;;  %s2509_s22 = smov 0  }
   0xc   :  { %s2511_s23 = smov 0   ;;  %s2513_s24 = smov 0  }
   0xd LB: > { %s2528_s25 = sadd.s32 4294967295, %s2461_s24   ;;  %s1674_s26 = sadd.s32 4294967294, %s2461_s24   ;;  %s2461_s24 = sphi %s2513_s24, %s2851_s24   ;;  %s2457_s23 = sphi %s2511_s23, %s2850_s23   ;;  %s2453_s22 = sphi %s2509_s22, %s2849_s22   ;;  %s2449_s21 = sphi %s2507_s21, %s2848_s21  }
   0xe   : > { %p46_p0 = scmp.ne.s32.totalorder %s2453_s22, %s2449_s21  ;;  %p47_p1 = scmp.eq.s32.totalorder %s2528_s25, 0 }
   0xf   : > { %p180_p2 = scmp.eq.s32.totalorder %s2528_s25, 1  ;;  %p186_p3 = scmp.eq.s32.totalorder %s1674_s26, 1 }
  0x10   : > { %p2537_p4 = por %p47_p1, %p46_p0  ;;  %p1675_p5 = scmp.ge.s32.totalorder %s2461_s24, 1 }
  0x11   : > { %p2542_p6 = por %p186_p3, %p46_p0  ;;  %p193_p7 = scmp.lt.s32.totalorder %s2461_s24, 3 }
  0x12   : > { %s2837_s2 = sld [smem:[#allocation19_spill]]  ;;  %s2463_s9 = smov [#allocation7]  }
  0x13   : > { %p2550_p8 = pnand %p1675_p5, %p193_p7  ;;  %s206_s10 = sshll.u32 %s2463_s9, 4  ;;  %s207_s10 = int_to_ptr.vmem [resolvable:$true] %s206_s10 }
  0x14   : > { %s2840_s3 = sld [smem:[#allocation20_spill]]  ;;  %s2464_s15 = smov 512  }
  0x15   : > { %p2126_p9 = pneg %p2550_p8  ;;  %s2465_s16 = smov 32  }
  0x16   : > { %s2466_s17 = smov [#allocation8]   ;;  %s2841_s4 = sld [smem:[#allocation21_spill]] }
  0x17   : > { %p2558_p10 = pnand %p2126_p9, %p47_p1  ;;  %s221_s18 = sshll.u32 %s2466_s17, 4  ;;  %s222_s18 = int_to_ptr.vmem [resolvable:$true] %s221_s18 }
  0x18   : > { %s204_s7 = sshll.u32 %s2837_s2, 4  ;;  %s2467_s29 = smov [#allocation10]   ;;  %s205_s7 = int_to_ptr.hbm [resolvable:$true] %s204_s7 }
  0x19   : > { %2129 = dma.hbm_to_vmem [thread:$0]  (!%p2558_p10), %s205_s7, 2048, %s207_s10, [#allocation6], %s2464_s15, %s2464_s15, %s2465_s16  }
  0x1a   : > { %s219_s14 = sshll.u32 %s2840_s3, 4  ;;  %s232_s30 = sshll.u32 %s2467_s29, 4  ;;  %s220_s14 = int_to_ptr.hbm [resolvable:$true] %s219_s14  ;;  %s233_s30 = int_to_ptr.vmem [resolvable:$true] %s232_s30 }
  0x1b   : > { %2132 = dma.hbm_to_vmem [thread:$0]  (!%p2558_p10), %s220_s14, 128, %s222_s18, [#allocation9]  }
  0x1c   : > { %s230_s26 = sshll.u32 %s2841_s4, 4  ;;  %s2468_s7 = smov 64   ;;  %s231_s26 = int_to_ptr.hbm [resolvable:$true] %s230_s26 }
  0x1d   : > { %s2469_s9 = smov 4   ;;  %s2576_s10 = sadd.s32 1, %s2461_s24  }
  0x1e   : > { %2135 = dma.hbm_to_vmem [thread:$0]  (!%p2558_p10), %s231_s26, 8192, %s233_s30, [#allocation9], %s2468_s7, %s2468_s7, %s2469_s9  }
  0x1f   : > { %s30_s12 = ssub.s32 %s2461_s24, %s2576_s10  ;;  %s33_s13 = sadd.s32 1, %s2457_s23 }
  0x20   : > { %p31_p12 = scmp.eq.s32.totalorder %s30_s12, 0  ;;  %p40_p13 = scmp.ne.s32.totalorder %s2457_s23, %s2453_s22 }
  0x21   : > { %p41_p0 = scmp.eq.s32.totalorder %s2461_s24, 0  ;;  %p2150_p3 = scmp.lt.s32.totalorder %s2461_s24, 2 }
  0x22   : > { %s2586_s14 = scalar_select %p31_p12, %s2457_s23, %s33_s13  }
  0x23   : > { %p42_p5 = por %p41_p0, %p40_p13  ;;  %p2590_p7 = por %p180_p2, %p40_p13 }
  0x24   : > { %2842 = sst [smem:[#allocation17_spill]] %s2586_s14  ;;  %s249_s11 = sand.u32 1, %s2457_s23  }
  0x25   : > { %s2026_s16 = sshll.u32 %s2461_s24, 6  ;;  %s2596_s17 = sshll.u32 %s249_s11, 6 }
  0x26   : > { %s2844_s0 = sld [smem:[#allocation18_spill]]  ;;  %s253_s29 = scalar_lea.vmem [#allocation2], %s2596_s17 }
  0x27   : > { %s261_s30 = sshll.u32 %s253_s29, 4  ;;  %p2604_p9 = pnand %p2150_p3, %p42_p5  ;;  %s262_s30 = int_to_ptr.vmem [resolvable:$true] %s261_s30 }
  0x28   : > { %s280_s13 = scalar_lea.hbm %s2825_s1, %s2026_s16  ;;  %s250_s2 = scalar_lea.sflag [#allocation3], %s249_s11 }
  0x29   : > { %p2327_p10 = pneg %p2604_p9 }
  0x2c   : > { %s258_s20 = scalar_lea.hbm %s2844_s0, %s2026_s16  ;;  %s2330_s3 = scalar_lea.hbm %s2844_s0, 128 }
  0x2d   : > { %s259_s26 = sshll.u32 %s258_s20, 4  ;;  %s260_s26 = int_to_ptr.hbm [resolvable:$true] %s259_s26 }
  0x2e   : > { %s2323_s18 = sshra.s32 %s260_s26, 4  ;;  %s2324_s18 = int_to_ptr.hbm [resolvable:$true] %s2323_s18 }
  0x2f   : > { %s2325_s19 = scalar_lea.hbm %s2324_s18, 64  ;;  %p2331_p0 = scmp.lt.s32.totalorder %s2324_s18, %s2844_s0 }
  0x30   : > { %p2326_p2 = scmp.ne.s32.totalorder %s2324_s18, %s2325_s19  ;;  %p2332_p3 = scmp.lt.s32.totalorder %s2330_s3, %s2325_s19 }
  0x32   : > { %p2328_p12 = pnand %p2327_p10, %p2326_p2  ;;  %p2333_p5 = por %p2332_p3, %p2331_p0 }
  0x34   : > { %p2329_p13 = pneg %p2328_p12 }
  0x36   : > { %p2334_p11 = pnand %p2333_p5, %p2329_p13 }
  0x38   : > { %2337 = shalt.err (!%p2334_p11)
}
  0x39   : > { %s2470_s11 = smov 128   ;;  %s2471_s16 = smov 8  }
  0x3a   : > { %2139 = dma.hbm_to_vmem [thread:$0]  (!%p2604_p9), %s260_s26, 1024, %s262_s30, %s250_s2, %s2470_s11, %s2470_s11, %s2471_s16  }
  0x3b   : > { %s281_s12 = sshll.u32 %s280_s13, 4  ;;  %s275_s14 = scalar_lea.vmem [#allocation5], %s2596_s17  ;;  %s282_s12 = int_to_ptr.hbm [resolvable:$true] %s281_s12 }
  0x3c   : > { %s283_s20 = sshll.u32 %s275_s14, 4  ;;  %s271_s29 = sand.u32 1, %s2461_s24   ;;  %s284_s20 = int_to_ptr.vmem [resolvable:$true] %s283_s20 }
  0x3d   : > { %s272_s4 = scalar_lea.sflag [#allocation6], %s271_s29  ;;  %s2353_s18 = sshra.s32 %s282_s12, 4  ;;  %s2354_s18 = int_to_ptr.hbm [resolvable:$true] %s2353_s18 }
  0x3e   : > { %s2355_s3 = scalar_lea.hbm %s2354_s18, 64  ;;  %s2360_s0 = scalar_lea.hbm %s2825_s1, 128 }
  0x3f   : > { %p2356_p2 = scmp.ne.s32.totalorder %s2354_s18, %s2355_s3  ;;  %p2361_p13 = scmp.lt.s32.totalorder %s2354_s18, %s2825_s1 }
  0x40   : > { %p2362_p0 = scmp.lt.s32.totalorder %s2360_s0, %s2355_s3 }
  0x41   : > { %p2358_p11 = pnand %p2356_p2, %p2327_p10 }
  0x42   : > { %p2363_p3 = por %p2362_p0, %p2361_p13 }
  0x43   : > { %p2359_p12 = pneg %p2358_p11 }
  0x45   : > { %p2364_p5 = pnand %p2363_p3, %p2359_p12 }
  0x47   : > { %2367 = shalt.err (!%p2364_p5)
}
  0x48   : > { %2142 = dma.hbm_to_vmem [thread:$0]  (!%p2604_p9), %s282_s12, 1024, %s284_s20, %s272_s4, %s2470_s11, %s2470_s11, %s2471_s16  }
  0x49   : > { %295 = sbr.rel (%p2550_p8) target bundleno = 621 (0x26d), region = 44  ;;  %s2640_s14 = sand.u32 (!%p2550_p8), 1, %s2453_s22  }
  0x4a   : > { %s1687_s17 = sshll.u32 (!%p2550_p8), %s2640_s14, 6  ;;  %s298_s30 = scalar_lea.sflag (!%p2550_p8), [#allocation3], %s2640_s14 }
  0x4b   : > { %s2644_s13 = scalar_lea.vmem (!%p2550_p8), [#allocation2], %s1687_s17 }
  0x4e   : > { %2428 = dma.done.wait (%p2537_p4), %s298_s30, 1024  }
  0x4f   : > { %2430 = vsyncadd (%p2537_p4), %s298_s30, 4294966272  ;;  %s307_s0 = sand.u32 1, %s2528_s25   ;;  %s2651_s7 = scalar_lea.vmem [#allocation5], %s1687_s17 }
  0x50   : > { %s308_s8 = scalar_lea.sflag [#allocation6], %s307_s0 }
  0x51   : > { %2432 = dma.done.wait (%p2537_p4), %s308_s8, 1024  }
  0x52   : > { %2434 = vsyncadd (%p2537_p4), %s308_s8, 4294966272 }
  0x53   : > { %2436 = dma.done.wait (%p47_p1), [#allocation6], 2048  }
  0x54   : > { %2438 = vsyncadd (%p47_p1), [#allocation6], 4294965248 }
  0x55   : > { %2440 = dma.done.wait (%p47_p1), [#allocation9], 8320  }
  0x56   : > { %2442 = vsyncadd (%p47_p1), [#allocation9], 4294958976  ;;  %v368_v0 = vld [vmem:[%s2644_s13 + $0x20] sm:$0xff]  ;;  %vm388_vm0 = vcmask 261120   ;;  %v366_v2 = vld [vmem:[%s2644_s13 + $0x10] sm:$0xff]  ;;  %vm687_vm1 = vcmask 1041409  }
  0x57   : > { %v2667_v1 = vld [vmem:[%s2651_s7 + $0x20] sm:$0xff]  ;;  %v2672_v4 = vld [vmem:[%s2651_s7 + $0x10] sm:$0xff]  ;;  %v369_v9 = vld [vmem:[%s2644_s13 + $0x28] sm:$0xff]  ;;  %vm689_vm2 = vcmask 1042434   ;;  %vm691_vm3 = vcmask 1043459   ;;  %vm693_vm4 = vcmask 1044484  }
  0x58   : > { %v384_v3 = vmul.f32 %v2667_v1, %v368_v0  ;;  %v364_v5 = vld [vmem:[%s2644_s13] sm:$0xff]  ;;  %v382_v7 = vmul.f32 %v2672_v4, %v366_v2  ;;  %v2682_v10 = vld [vmem:[%s2651_s7 + $0x28] sm:$0xff]  ;;  %v367_v11 = vld [vmem:[%s2644_s13 + $0x18] sm:$0xff]  ;;  %vm695_vm5 = vcmask 1045509   ;;  %vm697_vm6 = vcmask 1046534   ;;  %s1692_s16 = sshll.u32 %s2640_s14, 3 }
  0x59   : > { %v2676_v6 = vld [vmem:[%s2651_s7] sm:$0xff]  ;;  %v2687_v13 = vld [vmem:[%s2651_s7 + $0x18] sm:$0xff]  ;;  %v365_v14 = vld [vmem:[%s2644_s13 + $0x8] sm:$0xff]  ;;  %v385_v18 = vmul.f32 %v2682_v10, %v369_v9  ;;  %vm699_vm7 = vcmask 1047559   ;;  %s2023_s12 = sshll.u32 %s2528_s25, 3  ;;  %s360_s18 = scalar_lea.vmem [#allocation11], %s1692_s16 }
  0x5a   : > { %v380_v8 = vmul.f32 %v2676_v6, %v364_v5  ;;  %v401_v12 = vsel %vm388_vm0, %v384_v3, 0.0  ;;  %v2691_v15 = vld [vmem:[%s2651_s7 + $0x8] sm:$0xff]  ;;  %v395_v16 = vsel %vm388_vm0, %v382_v7, 0.0  ;;  %v383_v19 = vmul.f32 %v2687_v13, %v367_v11  ;;  %v371_v24 = vld [vmem:[%s2644_s13 + $0x38] sm:$0xff]  ;;  %v370_v26 = vld [vmem:[%s2644_s13 + $0x30] sm:$0xff]  ;;  %s1548_s4 = scalar_lea.hbm %s2830_s6, %s2023_s12  ;;  %s1550_s3 = sshll.u32 %s360_s18, 4  ;;  %s1551_s3 = int_to_ptr.vmem [resolvable:$true] %s1550_s3 }
  0x5b   : > { %402 = vadd.xlane.f32.xlu2 %v401_v12  ;;  %396 = vadd.xlane.f32.xlu1 %v395_v16  ;;  %v381_v20 = vmul.f32 %v2691_v15, %v365_v14  ;;  %v404_v21 = vsel %vm388_vm0, %v385_v18, 0.0  ;;  %v2703_v25 = vld [vmem:[%s2651_s7 + $0x38] sm:$0xff]  ;;  %v2707_v27 = vld [vmem:[%s2651_s7 + $0x30] sm:$0xff]  ;;  %s1552_s19 = sshll.u32 %s1548_s4, 4  ;;  %s1538_s25 = scalar_lea.sflag [#allocation4], %s2640_s14  ;;  %s1553_s19 = int_to_ptr.hbm [resolvable:$true] %s1552_s19 }
  0x5c   : > { %v389_v17 = vsel %vm388_vm0, %v380_v8, 0.0  ;;  %v398_v22 = vsel %vm388_vm0, %v383_v19, 0.0  ;;  %v387_v28 = vmul.f32 %v2703_v25, %v371_v24  ;;  %v386_v29 = vmul.f32 %v2707_v27, %v370_v26  ;;  %s2397_s9 = sshra.s32 %s1553_s19, 4  ;;  %s2403_s30 = scalar_lea.hbm %s2830_s6, 16  ;;  %s2398_s9 = int_to_ptr.hbm [resolvable:$true] %s2397_s9 }
  0x5d   : > { %390 = vadd.xlane.f32.xlu0 %v389_v17  ;;  %v392_v23 = vsel %vm388_vm0, %v381_v20, 0.0  ;;  %s2399_s2 = scalar_lea.hbm %s2398_s9, 8  ;;  %p2404_p9 = scmp.lt.s32.totalorder %s2398_s9, %s2830_s6 }
  0x5e   : > { %v410_v30 = vsel %vm388_vm0, %v387_v28, 0.0  ;;  %v407_v31 = vsel %vm388_vm0, %v386_v29, 0.0  ;;  %p2400_p1 = scmp.ne.s32.totalorder %s2398_s9, %s2399_s2  ;;  %p2405_p10 = scmp.lt.s32.totalorder %s2403_s30, %s2399_s2 }
  0x60   : > { %p2401_p4 = pnand %p2400_p1, %p2590_p7  ;;  %p2406_p2 = por %p2405_p10, %p2404_p9 }
  0x62   : > { %p2402_p8 = pneg %p2401_p4 }
  0x63   : > { %405 = vadd.xlane.f32.xlu2 %v404_v21  ;;  %399 = vadd.xlane.f32.xlu1 %v398_v22 }
  0x64   : > { %p2407_p11 = pnand %p2406_p2, %p2402_p8 }
  0x65   : > { %393 = vadd.xlane.f32.xlu0 %v392_v23 }
  0x6b   : > { %411 = vadd.xlane.f32.xlu1 %v410_v30 }
  0x6d   : > { %408 = vadd.xlane.f32.xlu0 %v407_v31 }
  0xce   : > { %v403_v32 = vpop.xlane.xlu2 %402  ;;  %v397_v34 = vpop.xlane.xlu1 %396 }
  0xcf   : > { %v417_v33 = vmul.f32 0.17677669, %v403_v32  ;;  %v415_v36 = vmul.f32 0.17677669, %v397_v34 }
  0xd0   : > { %v391_v35 = vpop.xlane.xlu0 %390 }
  0xd1   : > { %v413_v37 = vmul.f32 0.17677669, %v391_v35  ;;  %v445_v38 = vrot.slane %v417_v33, 4  ;;  %v433_v39 = vrot.slane %v415_v36, 4 }
  0xd3   : > { %v421_v40 = vrot.slane %v413_v37, 4  ;;  %v446_v41 = vmax.f32 %v417_v33, %v445_v38  ;;  %v434_v42 = vmax.f32 %v415_v36, %v433_v39 }
  0xd5   : > { %v422_v43 = vmax.f32 %v413_v37, %v421_v40  ;;  %v447_v44 = vrot.slane %v446_v41, 2  ;;  %v435_v45 = vrot.slane %v434_v42, 2 }
  0xd6   : > { %v406_v47 = vpop.xlane.xlu2 %405  ;;  %v400_v50 = vpop.xlane.xlu1 %399 }
  0xd7   : > { %v423_v46 = vrot.slane %v422_v43, 2  ;;  %v448_v48 = vmax.f32 %v446_v41, %v447_v44  ;;  %v418_v49 = vmul.f32 0.17677669, %v406_v47  ;;  %v436_v52 = vmax.f32 %v434_v42, %v435_v45 }
  0xd8   : > { %v394_v51 = vpop.xlane.xlu0 %393  ;;  %v416_v54 = vmul.f32 0.17677669, %v400_v50 }
  0xd9   : > { %v424_v53 = vmax.f32 %v422_v43, %v423_v46  ;;  %v414_v55 = vmul.f32 0.17677669, %v394_v51  ;;  %v449_v56 = vrot.slane %v448_v48, 1  ;;  %v451_v57 = vrot.slane %v418_v49, 4 }
  0xda   : > { %v437_v58 = vrot.slane %v436_v52, 1  ;;  %v439_v60 = vrot.slane %v416_v54, 4 }
  0xdb   : > { %v425_v59 = vrot.slane %v424_v53, 1  ;;  %v427_v61 = vrot.slane %v414_v55, 4  ;;  %v450_v62 = vmax.f32 %v448_v48, %v449_v56  ;;  %v452_v63 = vmax.f32 %v418_v49, %v451_v57 }
  0xdc   : > { %v438_v0 = vmax.f32 %v436_v52, %v437_v58  ;;  %v440_v3 = vmax.f32 %v416_v54, %v439_v60 }
  0xdd   : > { %v426_v2 = vmax.f32 %v424_v53, %v425_v59  ;;  %v428_v5 = vmax.f32 %v414_v55, %v427_v61  ;;  %v473_v7 = vsub.f32 %v417_v33, %v450_v62  ;;  %v453_v8 = vrot.slane %v452_v63, 2 }
  0xde   : > { %v471_v9 = vsub.f32 %v415_v36, %v438_v0  ;;  %v441_v12 = vrot.slane %v440_v3, 2  ;;  %v412_v18 = vpop.xlane.xlu1 %411 }
  0xdf   : > { %v469_v11 = vsub.f32 %v413_v37, %v426_v2  ;;  %v429_v14 = vrot.slane %v428_v5, 2  ;;  %v485_v16 = vmul.f32 1.442695, %v473_v7  ;;  %v454_v17 = vmax.f32 %v452_v63, %v453_v8 }
  0xe0   : > { %v409_v19 = vpop.xlane.xlu0 %408  ;;  %v481_v20 = vmul.f32 1.442695, %v471_v9  ;;  %v442_v22 = vmax.f32 %v440_v3, %v441_v12  ;;  %v420_v26 = vmul.f32 0.17677669, %v412_v18 }
  0xe1   : > { %v477_v21 = vmul.f32 1.442695, %v469_v11  ;;  %v430_v23 = vmax.f32 %v428_v5, %v429_v14  ;;  %2197 = vpow2.f32 %v485_v16  ;;  %v455_v24 = vrot.slane %v454_v17, 1 }
  0xe2   : > { %v419_v28 = vmul.f32 0.17677669, %v409_v19  ;;  %2199 = vpow2.f32 %v481_v20  ;;  %v443_v29 = vrot.slane %v442_v22, 1  ;;  %v463_v32 = vrot.slane %v420_v26, 4 }
  0xe3   : > { %v431_v30 = vrot.slane %v430_v23, 1  ;;  %2201 = vpow2.f32 %v477_v21  ;;  %v456_v31 = vmax.f32 %v454_v17, %v455_v24 }
  0xe4   : > { %v457_v33 = vrot.slane %v419_v28, 4  ;;  %v444_v34 = vmax.f32 %v442_v22, %v443_v29  ;;  %v464_v37 = vmax.f32 %v420_v26, %v463_v32 }
  0xe5   : > { %v432_v35 = vmax.f32 %v430_v23, %v431_v30  ;;  %v474_v36 = vsub.f32 %v418_v49, %v456_v31 }
  0xe6   : > { %v458_v38 = vmax.f32 %v419_v28, %v457_v33  ;;  %v472_v39 = vsub.f32 %v416_v54, %v444_v34  ;;  %v465_v43 = vrot.slane %v464_v37, 2 }
  0xe7   : > { %v470_v40 = vsub.f32 %v414_v55, %v432_v35  ;;  %v2713_v41 = vpop.eup %2197  ;;  %v487_v42 = vmul.f32 1.442695, %v474_v36 }
  0xe8   : > { %v459_v44 = vrot.slane %v458_v38, 2  ;;  %v2715_v45 = vpop.eup %2199  ;;  %v517_v46 = vrot.slane %v2713_v41, 4  ;;  %v483_v47 = vmul.f32 1.442695, %v472_v39  ;;  %v466_v49 = vmax.f32 %v464_v37, %v465_v43 }
  0xe9   : > { %v479_v48 = vmul.f32 1.442695, %v470_v40  ;;  %v2718_v50 = vpop.eup %2201  ;;  %v505_v51 = vrot.slane %v2715_v45, 4  ;;  %2203 = vpow2.f32 %v487_v42 }
  0xea   : > { %v460_v52 = vmax.f32 %v458_v38, %v459_v44  ;;  %v518_v53 = vadd.f32 %v2713_v41, %v517_v46  ;;  %v493_v54 = vrot.slane %v2718_v50, 4  ;;  %2205 = vpow2.f32 %v483_v47 }
  0xeb   : > { %v506_v55 = vadd.f32 %v2715_v45, %v505_v51  ;;  %2207 = vpow2.f32 %v479_v48  ;;  %v467_v56 = vrot.slane %v466_v49, 1 }
  0xec   : > { %v461_v57 = vrot.slane %v460_v52, 1  ;;  %v519_v58 = vrot.slane %v518_v53, 2  ;;  %v494_v59 = vadd.f32 %v2718_v50, %v493_v54 }
  0xed   : > { %v507_v60 = vrot.slane %v506_v55, 2  ;;  %v468_v61 = vmax.f32 %v466_v49, %v467_v56 }
  0xee   : > { %v462_v62 = vmax.f32 %v460_v52, %v461_v57  ;;  %v520_v63 = vadd.f32 %v519_v58, %v518_v53  ;;  %v495_v0 = vrot.slane %v494_v59, 2 }
  0xef   : > { %v2725_v2 = vpop.eup %2203  ;;  %v508_v3 = vadd.f32 %v507_v60, %v506_v55  ;;  %v476_v5 = vsub.f32 %v420_v26, %v468_v61 }
  0xf0   : > { %v475_v7 = vsub.f32 %v419_v28, %v462_v62  ;;  %v2727_v8 = vpop.eup %2205  ;;  %v521_v9 = vrot.slane %v520_v63, 1  ;;  %v496_v11 = vadd.f32 %v495_v0, %v494_v59  ;;  %v523_v12 = vrot.slane %v2725_v2, 4 }
  0xf1   : > { %v2730_v14 = vpop.eup %2207  ;;  %v509_v16 = vrot.slane %v508_v3, 1  ;;  %v511_v17 = vrot.slane %v2727_v8, 4  ;;  %v491_v18 = vmul.f32 1.442695, %v476_v5 }
  0xf2   : > { %v522_v19 = vadd.f32 %v521_v9, %v520_v63  ;;  %v497_v20 = vrot.slane %v496_v11, 1  ;;  %v524_v21 = vadd.f32 %v2725_v2, %v523_v12  ;;  %v499_v22 = vrot.slane %v2730_v14, 4 }
  0xf3   : > { %v510_v23 = vadd.f32 %v509_v16, %v508_v3  ;;  %v512_v24 = vadd.f32 %v2727_v8, %v511_v17  ;;  %2209 = vpow2.f32 %v491_v18  ;;  %v489_v26 = vmul.f32 1.442695, %v475_v7 }
  0xf4   : > { %2211 = vrcp.f32 %v522_v19  ;;  %v498_v28 = vadd.f32 %v497_v20, %v496_v11  ;;  %v525_v29 = vrot.slane %v524_v21, 2  ;;  %v500_v30 = vadd.f32 %v2730_v14, %v499_v22 }
  0xf5   : > { %2213 = vrcp.f32 %v510_v23  ;;  %v513_v31 = vrot.slane %v512_v24, 2  ;;  %v1727_v23 = vld [vmem:[#allocation7 + $0x40] sm:$0xf] }
  0xf6   : > { %2215 = vrcp.f32 %v498_v28  ;;  %v526_v32 = vadd.f32 %v525_v29, %v524_v21  ;;  %v501_v33 = vrot.slane %v500_v30, 2 }
  0xf7   : > { %v514_v34 = vadd.f32 %v513_v31, %v512_v24  ;;  %2217 = vpow2.f32 %v489_v26  ;;  %v2040_v24 = vld [vmem:[#allocation7 + $0x5c] sm:$0xf0] }
  0xf8   : > { %v527_v35 = vrot.slane %v526_v32, 1  ;;  %v502_v36 = vadd.f32 %v501_v33, %v500_v30 }
  0xf9   : > { %v2737_v37 = vpop.eup %2209  ;;  %v515_v38 = vrot.slane %v514_v34, 1 }
  0xfa   : > { %v2212_v39 = vpop.eup %2211  ;;  %v528_v40 = vadd.f32 %v527_v35, %v526_v32  ;;  %v503_v42 = vrot.slane %v502_v36, 1  ;;  %v535_v43 = vrot.slane %v2737_v37, 4 }
  0xfb   : > { %v2214_v44 = vpop.eup %2213  ;;  %v553_v46 = vmul.f32 %v2212_v39, %v2713_v41  ;;  %v516_v47 = vadd.f32 %v515_v38, %v514_v34  ;;  %v1728_v34 = vor.u32 %v2040_v24, %v1727_v23 }
  0xfc   : > { %v2216_v48 = vpop.eup %2215  ;;  %v551_v51 = vmul.f32 %v2214_v44, %v2715_v45  ;;  %2219 = vrcp.f32 %v528_v40  ;;  %v504_v49 = vadd.f32 %v503_v42, %v502_v36  ;;  %v536_v52 = vadd.f32 %v2737_v37, %v535_v43  ;;  %v2036_v43 = vld [vmem:[#allocation7 + $0x44] sm:$0xf] }
  0xfd   : > { %v2743_v53 = vpop.eup %2217  ;;  %v561_v54 = vadd.f32 1.0, %v553_v46  ;;  %v549_v55 = vmul.f32 %v2216_v48, %v2718_v50  ;;  %2221 = vrcp.f32 %v516_v47  ;;  %791 = vmatpush.bf16.msra.mxu0 %v1728_v34 }
  0xfe   : > { %v559_v56 = vadd.f32 1.0, %v551_v51  ;;  %2223 = vrcp.f32 %v504_v49  ;;  %v537_v57 = vrot.slane %v536_v52, 2  ;;  %v529_v58 = vrot.slane %v2743_v53, 4  ;;  %v1735_v49 = vld [vmem:[#allocation7 + $0x48] sm:$0xf] }
  0xff   : > { %v569_v41 = vmul.f32 %v561_v54, %v2667_v1  ;;  %v557_v59 = vadd.f32 1.0, %v549_v55 }
 0x100   : > { %v567_v45 = vmul.f32 %v559_v56, %v2672_v4  ;;  %v538_v60 = vadd.f32 %v537_v57, %v536_v52  ;;  %v530_v61 = vadd.f32 %v2743_v53, %v529_v58 }
 0x101   : > { %v601_v62 = vsel %vm388_vm0, %v569_v41, 0.0  ;;  %v565_v63 = vmul.f32 %v557_v59, %v2676_v6  ;;  %v2037_v41 = vld [vmem:[#allocation7 + $0x4c] sm:$0xf] }
 0x102   : > { %v2220_v0 = vpop.eup %2219  ;;  %v602_v50 = vrot.slane %v601_v62, 4  ;;  %v587_v3 = vsel %vm388_vm0, %v567_v45, 0.0  ;;  %v539_v5 = vrot.slane %v538_v60, 1  ;;  %v531_v7 = vrot.slane %v530_v61, 2  ;;  %v1737_v59 = vld [vmem:[#allocation7 + $0x68] sm:$0xf0] }
 0x103   : > { %v2222_v9 = vpop.eup %2221  ;;  %v588_v11 = vrot.slane %v587_v3, 4  ;;  %v573_v1 = vsel %vm388_vm0, %v565_v63, 0.0  ;;  %v554_v12 = vmul.f32 %v2220_v0, %v2725_v2  ;;  %v2032_v63 = vld [vmem:[#allocation7 + $0x1c] sm:$0xf0] }
 0x104   : > { %v2224_v4 = vpop.eup %2223  ;;  %v603_v16 = vadd.f32 %v602_v50, %v601_v62  ;;  %v574_v17 = vrot.slane %v573_v1, 4  ;;  %v552_v18 = vmul.f32 %v2222_v9, %v2727_v8  ;;  %v540_v19 = vadd.f32 %v539_v5, %v538_v60  ;;  %v1695_v62 = vld [vmem:[#allocation7] sm:$0xf]  ;;  %v2028_v5 = vld [vmem:[#allocation7 + $0x4] sm:$0xf] }
 0x105   : > { %v589_v20 = vadd.f32 %v588_v11, %v587_v3  ;;  %v562_v6 = vadd.f32 1.0, %v554_v12  ;;  %v550_v21 = vmul.f32 %v2224_v4, %v2730_v14  ;;  %v532_v22 = vadd.f32 %v531_v7, %v530_v61  ;;  %v1697_v7 = vld [vmem:[#allocation7 + $0x20] sm:$0xf0]  ;;  %v1703_v4 = vld [vmem:[#allocation7 + $0x8] sm:$0xf] }
 0x106   : > { %v575_v26 = vadd.f32 %v574_v17, %v573_v1  ;;  %v560_v28 = vadd.f32 1.0, %v552_v18  ;;  %2225 = vrcp.f32 %v540_v19  ;;  %v604_v32 = vrot.slane %v603_v16, 2  ;;  %v2033_v19 = vld [vmem:[#allocation7 + $0x24] sm:$0xf0] }
 0x107   : > { %v590_v29 = vrot.slane %v589_v20, 2  ;;  %v570_v30 = vmul.f32 %v562_v6, %v2682_v10  ;;  %v558_v2 = vadd.f32 1.0, %v550_v21  ;;  %v533_v31 = vrot.slane %v532_v22, 1  ;;  %v1729_v10 = vld [vmem:[#allocation7 + $0x60] sm:$0xf0] }
 0x108   : > { %v576_v33 = vrot.slane %v575_v26, 2  ;;  %v568_v8 = vmul.f32 %v560_v28, %v2687_v13  ;;  %v2763_v13 = vadd.f32 %v604_v32, %v603_v16  ;;  %v1732_v56 = vor.u32 %v2036_v43, %v1729_v10  ;;  %v1705_v6 = vld [vmem:[#allocation7 + $0x28] sm:$0xf0]  ;;  %v2043_v32 = vld [vmem:[#allocation7 + $0x74] sm:$0xf0] }
 0x109   : > { %v608_v35 = vsel %vm388_vm0, %v570_v30, 0.0  ;;  %v566_v14 = vmul.f32 %v558_v2, %v2691_v15  ;;  %v534_v36 = vadd.f32 %v533_v31, %v532_v22  ;;  %v591_v38 = vadd.f32 %v590_v29, %v589_v20  ;;  %v2041_v15 = vld [vmem:[#allocation7 + $0x64] sm:$0xf0]  ;;  %v2029_v20 = vld [vmem:[#allocation7 + $0xc] sm:$0xf] }
 0x10a   : > { %v577_v39 = vadd.f32 %v576_v33, %v575_v26  ;;  %v609_v40 = vrot.slane %v608_v35, 4  ;;  %v594_v42 = vsel %vm388_vm0, %v568_v8, 0.0  ;;  %804 = vmatpush.bf16.msra.mxu1 %v1732_v56  ;;  %v1736_v61 = vor.u32 %v2041_v15, %v1735_v49  ;;  %v1751_v30 = vld [vmem:[#allocation7 + $0x58] sm:$0xf]  ;;  %v2039_v33 = vld [vmem:[#allocation7 + $0x5c] sm:$0xf] }
 0x10b   : > { %v595_v44 = vrot.slane %v594_v42, 4  ;;  %v580_v46 = vsel %vm388_vm0, %v566_v14, 0.0  ;;  %2227 = vrcp.f32 %v534_v36  ;;  %v592_v57 = vrot.slane %v591_v38, 1  ;;  %v1753_v8 = vld [vmem:[#allocation7 + $0x78] sm:$0xf0] }
 0x10c   : > { %v2226_v47 = vpop.eup %2225  ;;  %v578_v48 = vrot.slane %v577_v39, 1  ;;  %v581_v51 = vrot.slane %v580_v46, 4  ;;  %v610_v52 = vadd.f32 %v609_v40, %v608_v35  ;;  %v606_v0 = vrot.slane %v2763_v13, 1  ;;  %817 = vmatpush.bf16.msra.mxu2 %v1736_v61  ;;  %v1743_v36 = vld [vmem:[#allocation7 + $0x50] sm:$0xf] }
 0x10d   : > { %v596_v54 = vadd.f32 %v595_v44, %v594_v42  ;;  %v556_v55 = vmul.f32 %v2226_v47, %v2737_v37  ;;  %v1740_v12 = vor.u32 %v2037_v41, %v1737_v59  ;;  %v2768_v16 = vadd.f32 %v592_v57, %v591_v38  ;;  %v2042_v38 = vld [vmem:[#allocation7 + $0x6c] sm:$0xf0]  ;;  %v2035_v43 = vld [vmem:[#allocation7 + $0x34] sm:$0xf0]  ;;  %v2038_v10 = vld [vmem:[#allocation7 + $0x54] sm:$0xf] }
 0x10e   : > { %v582_v58 = vadd.f32 %v581_v51, %v580_v46  ;;  %v579_v50 = vadd.f32 %v578_v48, %v577_v39  ;;  %v611_v11 = vrot.slane %v610_v52, 2  ;;  %v1696_v23 = vor.u32 %v2032_v63, %v1695_v62  ;;  %v1719_v39 = vld [vmem:[#allocation7 + $0x18] sm:$0xf]  ;;  %v1745_v44 = vld [vmem:[#allocation7 + $0x70] sm:$0xf0] }
 0x10f   : > { %v597_v45 = vrot.slane %v596_v54, 2  ;;  %v564_v60 = vadd.f32 1.0, %v556_v55  ;;  %830 = vmatpush.bf16.msra.mxu3 %v1740_v12  ;;  %v1700_v24 = vor.u32 %v2028_v5, %v1697_v7  ;;  %v1704_v31 = vor.u32 %v2033_v19, %v1703_v4  ;;  %v2031_v49 = vld [vmem:[#allocation7 + $0x1c] sm:$0xf]  ;;  %v2034_v56 = vld [vmem:[#allocation7 + $0x2c] sm:$0xf0] }
 0x110   : > { %v583_v3 = vrot.slane %v582_v58, 2  ;;  %v629_v26 = vpack.c.bf16 %v579_v50, %v579_v50  ;;  %v612_v2 = vadd.f32 %v611_v11, %v610_v52  ;;  %792 = vmatpush.bf16.msra.mxu0 %v1696_v23  ;;  %v607_v40 = vadd.f32 %v606_v0, %v2763_v13  ;;  %v1711_v13 = vld [vmem:[#allocation7 + $0x10] sm:$0xf] }
 0x111   : > { %v2228_v9 = vpop.eup %2227  ;;  %v598_v37 = vadd.f32 %v597_v45, %v596_v54  ;;  %v572_v1 = vmul.f32 %v564_v60, %v2703_v25  ;;  %805 = vmatpush.bf16.msra.mxu1 %v1700_v24  ;;  %818 = vmatpush.bf16.msra.mxu2 %v1704_v31  ;;  %v631_v46 = vpack.c.bf16 %v2768_v16, %v2768_v16  ;;  %v2030_v45 = vld [vmem:[#allocation7 + $0x14] sm:$0xf] }
 0x112   : > { %v584_v17 = vadd.f32 %v583_v3, %v582_v58  ;;  %v555_v18 = vmul.f32 %v2228_v9, %v2743_v53  ;;  %v1708_v53 = vor.u32 %v2029_v20, %v1705_v6  ;;  %v679_v15 = vunpack.c.l.b16 %v629_v26  ;;  %v1713_v60 = vld [vmem:[#allocation7 + $0x30] sm:$0xf0] }
 0x113   : > { %v599_v21 = vrot.slane %v598_v37, 1  ;;  %v622_v22 = vsel %vm388_vm0, %v572_v1, 0.0  ;;  %v613_v52 = vrot.slane %v612_v2, 1  ;;  %v1752_v55 = vor.u32 %v2043_v32, %v1751_v30  ;;  %v2051_v32 = vld [vmem:[#allocation10 + $0x38] sm:$0xff] }
 0x114   : > { %v585_v25 = vrot.slane %v584_v17, 1  ;;  %v623_v28 = vrot.slane %v622_v22, 4  ;;  %v563_v29 = vadd.f32 1.0, %v555_v18  ;;  %831 = vmatpush.bf16.msra.mxu3 %v1708_v53  ;;  %v1756_v41 = vor.u32 %v2039_v33, %v1753_v8  ;;  %v2059_v33 = vld [vmem:[#allocation10 + $0x78] sm:$0xff] }
 0x115   : > { %v600_v42 = vadd.f32 %v599_v21, %v598_v37  ;;  %v1744_v59 = vor.u32 %v2042_v38, %v1743_v36  ;;  %869 = vmatpush.bf16.msrb.mxu2 %v1752_v55  ;;  %v1720_v63 = vor.u32 %v2035_v43, %v1719_v39  ;;  %v1748_v0 = vor.u32 %v2038_v10, %v1745_v44  ;;  %v2067_v8 = vld [vmem:[#allocation10 + $0xb8] sm:$0xff]  ;;  %v2066_v36 = vld [vmem:[#allocation10 + $0xb0] sm:$0xff]  ;;  %v2049_v39 = vld [vmem:[#allocation10 + $0x28] sm:$0xff] }
 0x116   : > { %v586_v34 = vadd.f32 %v585_v25, %v584_v17  ;;  %v624_v35 = vadd.f32 %v623_v28, %v622_v22  ;;  %v571_v14 = vmul.f32 %v563_v29, %v2707_v27  ;;  %v1721_v27 = vld [vmem:[#allocation7 + $0x38] sm:$0xf0]  ;;  %v1712_v7 = vor.u32 %v2034_v56, %v1711_v13  ;;  %v2073_v43 = vld [vmem:[#allocation10 + $0xe8] sm:$0xff]  ;;  %v2048_v10 = vld [vmem:[#allocation10 + $0x20] sm:$0xff] }
 0x117   : > { %v632_v61 = vpack.c.bf16 %v600_v42, %v600_v42  ;;  %843 = vmatpush.bf16.msrb.mxu0 %v1744_v59  ;;  %v1724_v5 = vor.u32 %v2031_v49, %v1721_v27  ;;  %v681_v9 = vunpack.c.l.b16 %v631_v46  ;;  %856 = vmatpush.bf16.msrb.mxu1 %v1748_v0  ;;  %v1716_v37 = vor.u32 %v2030_v45, %v1713_v60  ;;  %v2074_v38 = vld [vmem:[#allocation10 + $0xf0] sm:$0xff]  ;;  %v2065_v42 = vld [vmem:[#allocation10 + $0xa8] sm:$0xff]  ;;  %v2056_v44 = vld [vmem:[#allocation10 + $0x60] sm:$0xff] }
 0x118   : > { %v630_v47 = vpack.c.bf16 %v586_v34, %v586_v34  ;;  %v625_v48 = vrot.slane %v624_v35, 2  ;;  %v615_v51 = vsel %vm388_vm0, %v571_v14, 0.0  ;;  %882 = vmatpush.bf16.msrb.mxu3 %v1756_v41  ;;  %v614_v1 = vadd.f32 %v613_v52, %v612_v2  ;;  %v2075_v34 = vld [vmem:[#allocation10 + $0xf8] sm:$0xff]  ;;  %v2058_v14 = vld [vmem:[#allocation10 + $0x70] sm:$0xff]  ;;  %v2064_v46 = vld [vmem:[#allocation10 + $0xa0] sm:$0xff] }
 0x119   : > { %v616_v54 = vrot.slane %v615_v51, 4  ;;  %v633_v4 = vpack.c.bf16 %v607_v40, %v607_v40  ;;  %870 = vmatpush.bf16.msrb.mxu2 %v1720_v63  ;;  %v682_v18 = vunpack.c.l.b16 %v632_v61  ;;  %v2057_v40 = vld [vmem:[#allocation10 + $0x68] sm:$0xff]  ;;  %v2063_v49 = vld [vmem:[#allocation10 + $0x98] sm:$0xff]  ;;  %v2054_v52 = vld [vmem:[#allocation10 + $0x50] sm:$0xff] }
 0x11a   : > { %v680_v57 = vunpack.c.l.b16 %v630_v47  ;;  %v626_v58 = vadd.f32 %v625_v48, %v624_v35  ;;  %v634_v20 = vpack.c.bf16 %v614_v1, %v614_v1  ;;  %v2050_v35 = vld [vmem:[#allocation10 + $0x30] sm:$0xff]  ;;  %v2072_v47 = vld [vmem:[#allocation10 + $0xe0] sm:$0xff]  ;;  %v2047_v48 = vld [vmem:[#allocation10 + $0x18] sm:$0xff] }
 0x11b   : > { %v617_v62 = vadd.f32 %v616_v54, %v615_v51  ;;  %844 = vmatpush.bf16.msrb.mxu0 %v1712_v7  ;;  %857 = vmatpush.bf16.msrb.mxu1 %v1716_v37  ;;  %v683_v22 = vunpack.c.l.b16 %v633_v4  ;;  %v2055_v51 = vld [vmem:[#allocation10 + $0x58] sm:$0xff]  ;;  %v2062_v54 = vld [vmem:[#allocation10 + $0x90] sm:$0xff]  ;;  %v2045_v13 = vld [vmem:[#allocation10 + $0x8] sm:$0xff] }
 0x11c   : > { %v688_v50 = vsel %vm687_vm1, %v680_v57, %v679_v15  ;;  %v627_v3 = vrot.slane %v626_v58, 1  ;;  %883 = vmatpush.bf16.msrb.mxu3 %v1724_v5  ;;  %v684_v25 = vunpack.c.l.b16 %v634_v20  ;;  %v2071_v27 = vld [vmem:[#allocation10 + $0xd8] sm:$0xff]  ;;  %v2046_v15 = vld [vmem:[#allocation10 + $0x10] sm:$0xff]  ;;  %v2053_v56 = vld [vmem:[#allocation10 + $0x48] sm:$0xff] }
 0x11d   : > { %v618_v11 = vrot.slane %v617_v62, 2  ;;  %v690_v16 = vsel %vm689_vm2, %v681_v9, %v688_v50  ;;  %v2070_v55 = vld [vmem:[#allocation10 + $0xd0] sm:$0xff]  ;;  %v2061_v57 = vld [vmem:[#allocation10 + $0x88] sm:$0xff]  ;;  %v2044_v41 = vld [vmem:[#allocation10] sm:$0xff] }
 0x11e   : > { %v628_v12 = vadd.f32 %v627_v3, %v626_v58  ;;  %v692_v21 = vsel %vm691_vm3, %v682_v18, %v690_v16  ;;  %v2069_v58 = vld [vmem:[#allocation10 + $0xc8] sm:$0xff]  ;;  %v2052_v59 = vld [vmem:[#allocation10 + $0x40] sm:$0xff]  ;;  %v2083_v45 = vld [vmem:[#allocation10 + $0x138] sm:$0xff] }
 0x11f   : > { %v619_v17 = vadd.f32 %v618_v11, %v617_v62  ;;  %v694_v26 = vsel %vm693_vm4, %v683_v22, %v692_v21  ;;  %v2091_v60 = vld [vmem:[#allocation10 + $0x178] sm:$0xff]  ;;  %v2060_v61 = vld [vmem:[#allocation10 + $0x80] sm:$0xff]  ;;  %v2082_v50 = vld [vmem:[#allocation10 + $0x130] sm:$0xff] }
 0x120   : > { %v636_v6 = vpack.c.bf16 %v628_v12, %v628_v12  ;;  %v696_v30 = vsel %vm695_vm5, %v684_v25, %v694_v26  ;;  %v2068_v62 = vld [vmem:[#allocation10 + $0xc0] sm:$0xff]  ;;  %v2099_v63 = vld [vmem:[#allocation10 + $0x1b8] sm:$0xff]  ;;  %v2090_v3 = vld [vmem:[#allocation10 + $0x170] sm:$0xff] }
 0x121   : > { %v620_v19 = vrot.slane %v619_v17, 1  ;;  %v2107_v0 = vld [vmem:[#allocation10 + $0x1f8] sm:$0xff]  ;;  %v2081_v5 = vld [vmem:[#allocation10 + $0x128] sm:$0xff]  ;;  %v2098_v9 = vld [vmem:[#allocation10 + $0x1b0] sm:$0xff] }
 0x122   : > { %v686_v28 = vunpack.c.l.b16 %v636_v6  ;;  %v2089_v7 = vld [vmem:[#allocation10 + $0x168] sm:$0xff]  ;;  %v2106_v11 = vld [vmem:[#allocation10 + $0x1f0] sm:$0xff]  ;;  %v2080_v37 = vld [vmem:[#allocation10 + $0x120] sm:$0xff] }
 0x123   : > { %v621_v23 = vadd.f32 %v620_v19, %v619_v17  ;;  %v2088_v1 = vld [vmem:[#allocation10 + $0x160] sm:$0xff]  ;;  %v2097_v12 = vld [vmem:[#allocation10 + $0x1a8] sm:$0xff]  ;;  %v2079_v16 = vld [vmem:[#allocation10 + $0x118] sm:$0xff] }
 0x124   : > { %v2105_v4 = vld [vmem:[#allocation10 + $0x1e8] sm:$0xff]  ;;  %v2087_v17 = vld [vmem:[#allocation10 + $0x158] sm:$0xff]  ;;  %v2096_v18 = vld [vmem:[#allocation10 + $0x1a0] sm:$0xff] }
 0x125   : > { %v635_v24 = vpack.c.bf16 %v621_v23, %v621_v23  ;;  %v2104_v19 = vld [vmem:[#allocation10 + $0x1e0] sm:$0xff]  ;;  %v2078_v20 = vld [vmem:[#allocation10 + $0x110] sm:$0xff]  ;;  %v2095_v21 = vld [vmem:[#allocation10 + $0x198] sm:$0xff] }
 0x126   : > { %v2086_v6 = vld [vmem:[#allocation10 + $0x150] sm:$0xff]  ;;  %v2103_v22 = vld [vmem:[#allocation10 + $0x1d8] sm:$0xff]  ;;  %v2077_v23 = vld [vmem:[#allocation10 + $0x108] sm:$0xff] }
 0x127   : > { %v685_v29 = vunpack.c.l.b16 %v635_v24  ;;  %v2085_v24 = vld [vmem:[#allocation10 + $0x148] sm:$0xff]  ;;  %v2094_v26 = vld [vmem:[#allocation10 + $0x190] sm:$0xff] }
 0x128   : > { %v2102_v25 = vld [vmem:[#allocation10 + $0x1d0] sm:$0xff] }
 0x129   : > { %v698_v2 = vsel %vm697_vm6, %v685_v29, %v696_v30  ;;  %v2084_v29 = vld [vmem:[#allocation10 + $0x140] sm:$0xff]  ;;  %v2093_v30 = vld [vmem:[#allocation10 + $0x188] sm:$0xff] }
 0x12a   : > { %v700_v31 = vsel %vm699_vm7, %v686_v28, %v698_v2  ;;  %v2076_v28 = vld [vmem:[#allocation10 + $0x100] sm:$0xff]  ;;  %v2101_v2 = vld [vmem:[#allocation10 + $0x1c8] sm:$0xff] }
 0x12b   : > { %v701_v53 = vpack.c.b16 %v700_v31, %v700_v31  ;;  %v2092_v31 = vld [vmem:[#allocation10 + $0x180] sm:$0xff] }
 0x12d   : > { %1757 = vmatmul.msk.bf16.vlgmr.msra.gmra.mxu0 %vm388_vm0, %v701_v53  ;;  %1758 = vmatmul.msk.bf16.vlgmr.msra.gmra.mxu1 %vm388_vm0, %v701_v53 }
 0x12e   : > { %1759 = vmatmul.msk.bf16.vlgmr.msra.gmra.mxu2 %vm388_vm0, %v701_v53  ;;  %1760 = vmatmul.msk.bf16.vlgmr.msra.gmra.mxu3 %vm388_vm0, %v701_v53 }
 0x12f   : > { %1413 = vmatpush.bf16.msra.mxu0 %v2051_v32  ;;  %1426 = vmatpush.bf16.msra.mxu1 %v2059_v33  ;;  %v653_v32 = vld [vmem:[#allocation8] sm:$0xff] }
 0x130   : > { %1439 = vmatpush.bf16.msra.mxu2 %v2067_v8  ;;  %1452 = vmatpush.bf16.msra.mxu3 %v2075_v34  ;;  %v655_v33 = vperm.slane %v653_v32, 0  ;;  %v656_v8 = vperm.slane %v653_v32, 1 }
 0x133   : > { %1414 = vmatpush.bf16.msra.mxu0 %v2050_v35  ;;  %1427 = vmatpush.bf16.msra.mxu1 %v2058_v14 }
 0x134   : > { %1440 = vmatpush.bf16.msra.mxu2 %v2066_v36  ;;  %1453 = vmatpush.bf16.msra.mxu3 %v2074_v38 }
 0x137   : > { %1415 = vmatpush.bf16.msra.mxu0 %v2049_v39  ;;  %1428 = vmatpush.bf16.msra.mxu1 %v2057_v40  ;;  %v657_v40 = vperm.slane %v653_v32, 2 }
 0x138   : > { %1441 = vmatpush.bf16.msra.mxu2 %v2065_v42  ;;  %1454 = vmatpush.bf16.msra.mxu3 %v2073_v43  ;;  %v658_v42 = vperm.slane %v653_v32, 3 }
 0x13b   : > { %1416 = vmatpush.bf16.msra.mxu0 %v2048_v10  ;;  %1429 = vmatpush.bf16.msra.mxu1 %v2056_v44 }
 0x13c   : > { %1442 = vmatpush.bf16.msra.mxu2 %v2064_v46  ;;  %1455 = vmatpush.bf16.msra.mxu3 %v2072_v47 }
 0x13d   : > { %1761 = vmatmul.msk.bf16.vlgmr.msrb.gmra.mxu0 %vm388_vm0, %v701_v53  ;;  %1762 = vmatmul.msk.bf16.vlgmr.msrb.gmra.mxu1 %vm388_vm0, %v701_v53 }
 0x13e   : > { %1763 = vmatmul.msk.bf16.vlgmr.msrb.gmra.mxu2 %vm388_vm0, %v701_v53  ;;  %1764 = vmatmul.msk.bf16.vlgmr.msrb.gmra.mxu3 %vm388_vm0, %v701_v53  ;;  %v2100_v53 = vld [vmem:[#allocation10 + $0x1c0] sm:$0xff] }
 0x13f   : > { %1417 = vmatpush.bf16.msra.mxu0 %v2047_v48  ;;  %1430 = vmatpush.bf16.msra.mxu1 %v2055_v51 }
 0x140   : > { %1443 = vmatpush.bf16.msra.mxu2 %v2063_v49  ;;  %1456 = vmatpush.bf16.msra.mxu3 %v2071_v27  ;;  %v659_v27 = vperm.slane %v653_v32, 4 }
 0x143   : > { %1418 = vmatpush.bf16.msra.mxu0 %v2046_v15  ;;  %1431 = vmatpush.bf16.msra.mxu1 %v2054_v52  ;;  %v660_v15 = vperm.slane %v653_v32, 5 }
 0x144   : > { %1444 = vmatpush.bf16.msra.mxu2 %v2062_v54  ;;  %1457 = vmatpush.bf16.msra.mxu3 %v2070_v55 }
 0x147   : > { %1419 = vmatpush.bf16.msra.mxu0 %v2045_v13  ;;  %1432 = vmatpush.bf16.msra.mxu1 %v2053_v56 }
 0x148   : > { %1445 = vmatpush.bf16.msra.mxu2 %v2061_v57  ;;  %1458 = vmatpush.bf16.msra.mxu3 %v2069_v58 }
 0x14b   : > { %1420 = vmatpush.bf16.msra.mxu0 %v2044_v41  ;;  %1433 = vmatpush.bf16.msra.mxu1 %v2052_v59  ;;  %v661_v59 = vperm.slane %v653_v32, 6 }
 0x14c   : > { %1446 = vmatpush.bf16.msra.mxu2 %v2060_v61  ;;  %1459 = vmatpush.bf16.msra.mxu3 %v2068_v62 }
 0x14f   : > { %1465 = vmatpush.bf16.msrb.mxu0 %v2083_v45  ;;  %1478 = vmatpush.bf16.msrb.mxu1 %v2091_v60  ;;  %v662_v45 = vperm.slane %v653_v32, 7 }
 0x150   : > { %1491 = vmatpush.bf16.msrb.mxu2 %v2099_v63  ;;  %1504 = vmatpush.bf16.msrb.mxu3 %v2107_v0 }
 0x153   : > { %1466 = vmatpush.bf16.msrb.mxu0 %v2082_v50  ;;  %1479 = vmatpush.bf16.msrb.mxu1 %v2090_v3 }
 0x154   : > { %1492 = vmatpush.bf16.msrb.mxu2 %v2098_v9  ;;  %1505 = vmatpush.bf16.msrb.mxu3 %v2106_v11 }
 0x157   : > { %1467 = vmatpush.bf16.msrb.mxu0 %v2081_v5  ;;  %1480 = vmatpush.bf16.msrb.mxu1 %v2089_v7 }
 0x158   : > { %1493 = vmatpush.bf16.msrb.mxu2 %v2097_v12  ;;  %1506 = vmatpush.bf16.msrb.mxu3 %v2105_v4 }
 0x15b   : > { %1468 = vmatpush.bf16.msrb.mxu0 %v2080_v37  ;;  %1481 = vmatpush.bf16.msrb.mxu1 %v2088_v1  ;;  %v2196_v1 = vld [vmem:[%s2829_s5] ss:$0 sm:$0xff] }
 0x15c   : > { %1494 = vmatpush.bf16.msrb.mxu2 %v2096_v18  ;;  %1507 = vmatpush.bf16.msrb.mxu3 %v2104_v19 }
 0x15f   : > { %1469 = vmatpush.bf16.msrb.mxu0 %v2079_v16  ;;  %1482 = vmatpush.bf16.msrb.mxu1 %v2087_v17 }
 0x160   : > { %1495 = vmatpush.bf16.msrb.mxu2 %v2095_v21  ;;  %1508 = vmatpush.bf16.msrb.mxu3 %v2103_v22 }
 0x163   : > { %1470 = vmatpush.bf16.msrb.mxu0 %v2078_v20  ;;  %1483 = vmatpush.bf16.msrb.mxu1 %v2086_v6 }
 0x164   : > { %1496 = vmatpush.bf16.msrb.mxu2 %v2094_v26  ;;  %1509 = vmatpush.bf16.msrb.mxu3 %v2102_v25 }
 0x167   : > { %1471 = vmatpush.bf16.msrb.mxu0 %v2077_v23  ;;  %1484 = vmatpush.bf16.msrb.mxu1 %v2085_v24 }
 0x168   : > { %1497 = vmatpush.bf16.msrb.mxu2 %v2093_v30  ;;  %1510 = vmatpush.bf16.msrb.mxu3 %v2101_v2 }
 0x16b   : > { %1472 = vmatpush.bf16.msrb.mxu0 %v2076_v28  ;;  %1485 = vmatpush.bf16.msrb.mxu1 %v2084_v29 }
 0x16c   : > { %1498 = vmatpush.bf16.msrb.mxu2 %v2092_v31  ;;  %1511 = vmatpush.bf16.msrb.mxu3 %v2100_v53 }
 0x1aa   : > { %v794_v34 = vpop.f32.mrf.mxu0  ;;  %v807_v35 = vpop.f32.mrf.mxu1 }
 0x1ab   : > { %v795_v14 = vadd.f32 %v794_v34, %v655_v33  ;;  %v808_v36 = vadd.f32 %v807_v35, %v656_v8 }
 0x1ad   : > { %v889_v38 = vpack.c.bf16 %v795_v14, %v795_v14  ;;  %v890_v39 = vpack.c.bf16 %v808_v36, %v808_v36 }
 0x1af   : > { %1421 = vmatmul.bf16.vlgmr.msra.gmra.mxu0 %v889_v38  ;;  %1434 = vmatmul.bf16.vlgmr.msra.gmra.mxu1 %v890_v39 }
 0x1b1   : > { %v820_v43 = vpop.f32.mrf.mxu2  ;;  %v833_v10 = vpop.f32.mrf.mxu3 }
 0x1b2   : > { %v821_v44 = vadd.f32 %v820_v43, %v657_v40  ;;  %v834_v46 = vadd.f32 %v833_v10, %v658_v42  ;;  %v796_v47 = vpop.f32.mrf.mxu0  ;;  %v809_v48 = vpop.f32.mrf.mxu1 }
 0x1b4   : > { %v891_v51 = vpack.c.bf16 %v821_v44, %v821_v44  ;;  %v892_v49 = vpack.c.bf16 %v834_v46, %v834_v46 }
 0x1b6   : > { %1447 = vmatmul.bf16.vlgmr.msra.gmra.mxu2 %v891_v51  ;;  %1460 = vmatmul.bf16.vlgmr.msra.gmra.mxu3 %v892_v49 }
 0x1b9   : > { %v822_v52 = vpop.f32.mrf.mxu2  ;;  %v835_v54 = vpop.f32.mrf.mxu3 }
 0x1ba   : > { %v846_v55 = vpop.f32.mrf.mxu0  ;;  %v859_v13 = vpop.f32.mrf.mxu1 }
 0x1bb   : > { %v847_v56 = vadd.f32 %v846_v55, %v659_v27  ;;  %v860_v57 = vadd.f32 %v859_v13, %v660_v15 }
 0x1bd   : > { %v893_v58 = vpack.c.bf16 %v847_v56, %v847_v56  ;;  %v894_v41 = vpack.c.bf16 %v860_v57, %v860_v57 }
 0x1bf   : > { %1473 = vmatmul.bf16.vlgmr.msrb.gmra.mxu0 %v893_v58  ;;  %1486 = vmatmul.bf16.vlgmr.msrb.gmra.mxu1 %v894_v41 }
 0x1c1   : > { %v872_v60 = vpop.f32.mrf.mxu2  ;;  %v885_v61 = vpop.f32.mrf.mxu3 }
 0x1c2   : > { %v873_v62 = vadd.f32 %v872_v60, %v661_v59  ;;  %v886_v63 = vadd.f32 %v885_v61, %v662_v45  ;;  %v848_v0 = vpop.f32.mrf.mxu0  ;;  %v861_v50 = vpop.f32.mrf.mxu1 }
 0x1c4   : > { %v895_v3 = vpack.c.bf16 %v873_v62, %v873_v62  ;;  %v896_v5 = vpack.c.bf16 %v886_v63, %v886_v63 }
 0x1c6   : > { %1499 = vmatmul.bf16.vlgmr.msrb.gmra.mxu2 %v895_v3  ;;  %1512 = vmatmul.bf16.vlgmr.msrb.gmra.mxu3 %v896_v5 }
 0x1c9   : > { %v874_v7 = vpop.f32.mrf.mxu2  ;;  %v887_v9 = vpop.f32.mrf.mxu3 }
 0x22c   : > { %v1422_v11 = vpop.f32.mrf.mxu0  ;;  %v1435_v37 = vpop.f32.mrf.mxu1 }
 0x22d   : > { %v1423_v16 = vadd.f32 %v2196_v1, %v1422_v11 }
 0x22f   : > { %v1436_v19 = vadd.f32 %v1435_v37, %v1423_v16 }
 0x234   : > { %v1424_v12 = vpop.f32.mrf.mxu0  ;;  %v1437_v4 = vpop.f32.mrf.mxu1 }
 0x239   : > { %v1448_v17 = vpop.f32.mrf.mxu2  ;;  %v1461_v18 = vpop.f32.mrf.mxu3 }
 0x23a   : > { %v1449_v20 = vadd.f32 %v1448_v17, %v1436_v19 }
 0x23c   : > { %v1474_v6 = vpop.f32.mrf.mxu0  ;;  %v1487_v21 = vpop.f32.mrf.mxu1  ;;  %v1462_v22 = vadd.f32 %v1461_v18, %v1449_v20 }
 0x23e   : > { %v1475_v26 = vadd.f32 %v1474_v6, %v1462_v22 }
 0x240   : > { %v1488_v29 = vadd.f32 %v1487_v21, %v1475_v26 }
 0x241   : > { %v1450_v23 = vpop.f32.mrf.mxu2  ;;  %v1463_v24 = vpop.f32.mrf.mxu3 }
 0x244   : > { %v1476_v25 = vpop.f32.mrf.mxu0  ;;  %v1489_v28 = vpop.f32.mrf.mxu1 }
 0x249   : > { %v1500_v30 = vpop.f32.mrf.mxu2  ;;  %v1513_v2 = vpop.f32.mrf.mxu3 }
 0x24a   : > { %v1501_v31 = vadd.f32 %v1500_v30, %v1488_v29 }
 0x24c   : > { %v1514_v53 = vadd.f32 %v1513_v2, %v1501_v31 }
 0x24e   : > { %v2021_v32 = vmul.f32 -1.442695, %v1514_v53 }
 0x250   : > { %2229 = vpow2.f32 %v2021_v32 }
 0x251   : > { %v1502_v33 = vpop.f32.mrf.mxu2  ;;  %v1515_v8 = vpop.f32.mrf.mxu3 }
 0x256   : > { %v2230_v34 = vpop.eup %2229 }
 0x257   : > { %v1520_v35 = vadd.f32 1.0, %v2230_v34 }
 0x259   : > { %2231 = vrcp.f32 %v1520_v35  ;;  %v1532_v39 = vand.u32 2147483648, %v1520_v35  ;;  %v1530_v42 = vand.u32 2147483647, %v1520_v35  ;;  %vm1526_vm9 = vweird.f32 %v1520_v35 }
 0x25b   : > { %v1533_v10 = vor.u32 1.1754944e-38, %v1532_v39  ;;  %vm1531_vm11 = vcmp.eq.f32.partialorder %v1530_v42, 8.507059e+37 }
 0x25f   : > { %v2232_v14 = vpop.eup %2231 }
 0x260   : > { %v1522_v36 = vmul.f32 %v2232_v14, %v1520_v35  ;;  %vm1527_vm8 = vweird.f32 %v2232_v14 }
 0x261   : > { %vm1528_vm10 = vmor %vm1526_vm9, %vm1527_vm8 }
 0x262   : > { %v1523_v38 = vsub.f32 1.0, %v1522_v36 }
 0x264   : > { %v1524_v40 = vmul.f32 %v2232_v14, %v1523_v38 }
 0x266   : > { %v1525_v43 = vadd.f32 %v2232_v14, %v1524_v40 }
 0x268   : > { %v1529_v44 = vsel %vm1528_vm10, %v2232_v14, %v1525_v43 }
 0x269   : > { %v1534_v46 = vsel %vm1531_vm11, %v1533_v10, %v1529_v44 }
 0x26a   : > { %1536 = vst [vmem:[%s360_s18] sm:$0xff] %v1534_v46 }
 0x26b   : > { %2410 = shalt.err (!%p2407_p11)
}
 0x26c   : > { %2124 = dma.vmem_to_hbm [thread:$0]  (%p2590_p7), %s1551_s3, 128, %s1553_s19, %s1538_s25  }
 0x26d PF: > { %s1564_s14 = sand.u32 1, %s2449_s21   ;;  %p2846_p12 = scmp.ge.s32.totalorder %s2461_s24, 2 }
 0x26e   : > { %s1565_s8 = scalar_lea.sflag [#allocation4], %s1564_s14 }
 0x26f   : > { %p2144_p13 = pnand %p2846_p12, %p2542_p6 }
 0x271   : > { %p2145_p0 = pneg %p2144_p13 }
 0x273   : > { %2444 = dma.done.wait (%p2145_p0), %s1565_s8, 128  }
 0x274   : > { %2446 = vsyncadd (%p2145_p0), %s1565_s8, 4294967168  ;;  %s2847_s7 = sld [smem:[#allocation17_spill]]  ;;  %p23_p3 = scmp.ge.s32.totalorder %s2576_s10, 4  }
 0x275   : > { %s2848_s21 = smov %s2453_s22  ;;  %s2849_s22 = smov %s2457_s23 }
 0x276   : > { %s2851_s24 = smov %s2576_s10  ;;  %25 = sbr.rel (!%p23_p3) target bundleno = 13 (0xd), region = 114 }
 0x27a   : > { %s2850_s23 = smov %s2847_s7 }
 0x27b   :  { %1571 = vsyncpa [#allocation3], 1 }
 0x27c   :  { %1573 = vsyncpa [#allocation3 + $0x1], 1 }
 0x27d   :  { %1574 = vsyncpa [#allocation6], 1 }
 0x27e   :  { %1576 = vsyncpa [#allocation6 + $0x1], 1 }
 0x27f   :  { %1577 = vsyncpa [#allocation9], 1 }
 0x280   :  { %1578 = vsyncpa [#allocation4], 1 }
 0x281   :  { %1580 = vsyncpa [#allocation4 + $0x1], 1 }

</bundles_post_ra>
